<compile_context>
chip_gen: v7x
topology: tpu7x:2x2x1
jax: 0.10.0
libtpu: 0.0.40
codegen_flags: <defaults>
</compile_context>

<pallas_src>
import functools

import jax
import jax.numpy as jnp
from jax.experimental import pallas as pl
from jax.experimental.pallas import tpu as pltpu


def _ffn_kernel(x_ref, w_in_ref, b_in_ref, w_out_ref, b_out_ref, o_ref,
                *, approximate_gelu):
    # x_ref:     (tm, H)   streamed row tile (native dtype)
    # w_in_ref:  (H, F)    VMEM-resident
    # b_in_ref:  (1, F)
    # w_out_ref: (F, H)    VMEM-resident
    # b_out_ref: (1, H)
    # o_ref:     (tm, H)

    # First linear on the MXU: match operand dtype to the (possibly bf16)
    # weights -> single-pass bf16 MXU; accumulate in f32.
    x = x_ref[...].astype(w_in_ref.dtype)
    h = jnp.dot(x, w_in_ref[...], preferred_element_type=jnp.float32)
    h = h + b_in_ref[...].astype(jnp.float32)

    # GELU in f32 (tanh approximation by default; exact erf behind a flag).
    h = jax.nn.gelu(h, approximate=approximate_gelu)

    # Second linear: back to weight dtype for the MXU, f32 accumulation.
    h = h.astype(w_out_ref.dtype)
    out = jnp.dot(h, w_out_ref[...], preferred_element_type=jnp.float32)
    out = out + b_out_ref[...].astype(jnp.float32)

    o_ref[...] = out.astype(o_ref.dtype)


def _round_up(x, m):
    return ((x + m - 1) // m) * m


@functools.partial(jax.jit,
                   static_argnames=("tm", "use_bf16_mxu", "exact_gelu"))
def position_wise_feed_forward(h_V, w_in, b_in, w_out, b_out, *,
                               tm=1024, use_bf16_mxu=True, exact_gelu=False):
    """h_V: [B, L, num_hidden] -> [B, L, num_hidden]."""
    B, L, H = h_V.shape
    F = w_in.shape[1]
    N = B * L

    # Row tile: multiple of 16 (covers f32/bf16 sublane tiles).  Cap at
    # ~cdiv(N, 2) so the parallel grid has >= 2 blocks (v7x dual TC) whenever
    # N is larger than one sublane tile; Pallas masks the ragged last block.
    sublane = 16
    half = _round_up(max(pl.cdiv(N, 2), 1), sublane)
    tm_eff = max(sublane, min(tm, half))
    grid = (pl.cdiv(N, tm_eff),)

    x = h_V.reshape(N, H)

    if use_bf16_mxu:
        w_in_k = w_in.astype(jnp.bfloat16)
        w_out_k = w_out.astype(jnp.bfloat16)
    else:
        w_in_k, w_out_k = w_in, w_out

    b_in_2d = b_in.reshape(1, F)
    b_out_2d = b_out.reshape(1, H)

    kernel = functools.partial(_ffn_kernel, approximate_gelu=not exact_gelu)

    out = pl.pallas_call(
        kernel,
        out_shape=jax.ShapeDtypeStruct((N, H), h_V.dtype),
        grid_spec=pl.GridSpec(
            grid=grid,
            in_specs=[
                pl.BlockSpec((tm_eff, H), lambda i: (i, 0)),   # x row tile
                pl.BlockSpec((H, F), lambda i: (0, 0)),        # W_in (resident)
                pl.BlockSpec((1, F), lambda i: (0, 0)),        # b_in
                pl.BlockSpec((F, H), lambda i: (0, 0)),        # W_out (resident)
                pl.BlockSpec((1, H), lambda i: (0, 0)),        # b_out
            ],
            out_specs=pl.BlockSpec((tm_eff, H), lambda i: (i, 0)),
        ),
        compiler_params=pltpu.CompilerParams(
            dimension_semantics=("parallel",),
        ),
    )(x, w_in_k, b_in_2d, w_out_k, b_out_2d)

    return out.reshape(B, L, H)


def init_params(key, num_hidden, num_ff, dtype=jnp.float32):
    """Deterministic init mimicking torch.nn.Linear defaults (uniform)."""
    k1, k2, k3, k4 = jax.random.split(key, 4)
    lim_in = 1.0 / jnp.sqrt(num_hidden)
    lim_out = 1.0 / jnp.sqrt(num_ff)
    # Stored transposed relative to torch: [in_features, out_features].
    w_in = jax.random.uniform(k1, (num_hidden, num_ff), dtype, -lim_in, lim_in)
    b_in = jax.random.uniform(k2, (num_ff,), dtype, -lim_in, lim_in)
    w_out = jax.random.uniform(k3, (num_ff, num_hidden), dtype, -lim_out, lim_out)
    b_out = jax.random.uniform(k4, (num_hidden,), dtype, -lim_out, lim_out)
    return w_in, b_in, w_out, b_out


def _reference(h_V, w_in, b_in, w_out, b_out, *, bf16=False, approx=False):
    """Pure-JAX reference. bf16/approx mimic the fast kernel path."""
    dt = jnp.bfloat16 if bf16 else w_in.dtype
    x = h_V.reshape(-1, h_V.shape[-1])
    h = jnp.dot(x.astype(dt), w_in.astype(dt),
                preferred_element_type=jnp.float32) + b_in
    h = jax.nn.gelu(h, approximate=approx)
    out = jnp.dot(h.astype(dt), w_out.astype(dt),
                  preferred_element_type=jnp.float32) + b_out
    return out.reshape(h_V.shape).astype(h_V.dtype)


if __name__ == "__main__":
    num_hidden = 128
    num_ff = 256

    key = jax.random.PRNGKey(0)
    k_x, k_p, k_x2 = jax.random.split(key, 3)
    w_in, b_in, w_out, b_out = init_params(k_p, num_hidden, num_ff)

    # Case 1: small tile-aligned input, default fast path (bf16 MXU + tanh GELU).
    B, L = 2, 8
    h_V = jax.random.normal(k_x, (B, L, num_hidden), jnp.float32)
    out = jax.block_until_ready(
        position_wise_feed_forward(h_V, w_in, b_in, w_out, b_out))
    ref_fast = _reference(h_V, w_in, b_in, w_out, b_out, bf16=True, approx=True)
    ref_exact = _reference(h_V, w_in, b_in, w_out, b_out)
    assert out.shape == (B, L, num_hidden)
    assert jnp.allclose(out, ref_fast, atol=2e-2, rtol=2e-2), \
        "mismatch vs bf16/tanh reference (aligned)"
    assert jnp.allclose(out, ref_exact, atol=5e-2, rtol=5e-2), \
        "mismatch vs exact f32 reference (aligned, loose)"

    # Case 2: ragged row count (N = 21) exercising the masked last block.
    B2, L2 = 3, 7
    h_V2 = jax.random.normal(k_x2, (B2, L2, num_hidden), jnp.float32)
    out2 = jax.block_until_ready(
        position_wise_feed_forward(h_V2, w_in, b_in, w_out, b_out))
    ref2 = _reference(h_V2, w_in, b_in, w_out, b_out, bf16=True, approx=True)
    assert out2.shape == (B2, L2, num_hidden)
    assert jnp.allclose(out2, ref2, atol=2e-2, rtol=2e-2), \
        "mismatch vs bf16/tanh reference (ragged)"

    # Case 3: strict torch-parity path (f32 MXU + exact erf GELU).
    out3 = jax.block_until_ready(
        position_wise_feed_forward(h_V2, w_in, b_in, w_out, b_out,
                                   use_bf16_mxu=False, exact_gelu=True))
    ref3 = _reference(h_V2, w_in, b_in, w_out, b_out)
    assert jnp.allclose(out3, ref3, atol=1e-5, rtol=1e-5), \
        "mismatch vs exact f32 reference (parity path)"

    print("KERNEL_OK")
</pallas_src>

<mosaic_0001>
module attributes {stable_mosaic.version = 11 : i64} {
  func.func @_ffn_kernel(%arg0: i32, %arg1: memref<16x128xf32, #tpu.memory_space<vmem>>, %arg2: memref<128x256xbf16, #tpu.memory_space<vmem>>, %arg3: memref<1x256xf32, #tpu.memory_space<vmem>>, %arg4: memref<256x128xbf16, #tpu.memory_space<vmem>>, %arg5: memref<1x128xf32, #tpu.memory_space<vmem>>, %arg6: memref<16x128xf32, #tpu.memory_space<vmem>>) attributes {dimension_semantics = [#tpu.dimension_semantics<parallel>], iteration_bounds = array<i64: 1>, scalar_prefetch = 0 : i64, scratch_operands = 0 : i64, tpu.core_type = #tpu.core_type<tc>, window_params = [{transform_indices = @transform_0, window_bounds = array<i64: 16, 128>}, {pipeline_mode = #tpu.pipeline_mode<synchronous>, transform_indices = @transform_1, window_bounds = array<i64: 128, 256>}, {pipeline_mode = #tpu.pipeline_mode<synchronous>, transform_indices = @transform_2, window_bounds = array<i64: 1, 256>}, {pipeline_mode = #tpu.pipeline_mode<synchronous>, transform_indices = @transform_3, window_bounds = array<i64: 256, 128>}, {pipeline_mode = #tpu.pipeline_mode<synchronous>, transform_indices = @transform_4, window_bounds = array<i64: 1, 128>}, {transform_indices = @transform_5, window_bounds = array<i64: 16, 128>}]} {
    %c0 = arith.constant 0 : index
    %c0_0 = arith.constant 0 : index
    %0 = vector.load %arg1[%c0, %c0_0] : memref<16x128xf32, #tpu.memory_space<vmem>>, vector<16x128xf32>
    %1 = arith.truncf %0 : vector<16x128xf32> to vector<16x128xbf16>
    %c0_1 = arith.constant 0 : index
    %c0_2 = arith.constant 0 : index
    %2 = vector.load %arg2[%c0_1, %c0_2] : memref<128x256xbf16, #tpu.memory_space<vmem>>, vector<128x256xbf16>
    %cst = arith.constant dense<0.000000e+00> : vector<16x256xf32>
    %3 = tpu.matmul %1, %2, %cst {dimension_numbers = #tpu.dot_dimension_numbers<[1], [0], [0], [1], [0, 0, 1, 1], [], []>} : vector<16x128xbf16>, vector<128x256xbf16>, vector<16x256xf32> -> vector<16x256xf32>
    %c0_3 = arith.constant 0 : index
    %c0_4 = arith.constant 0 : index
    %4 = vector.load %arg3[%c0_3, %c0_4] : memref<1x256xf32, #tpu.memory_space<vmem>>, vector<1x256xf32>
    %5 = vector.broadcast %4 : vector<1x256xf32> to vector<16x256xf32>
    %6 = arith.addf %3, %5 : vector<16x256xf32>
    %7 = arith.mulf %6, %6 : vector<16x256xf32>
    %8 = arith.mulf %6, %7 : vector<16x256xf32>
    %cst_5 = arith.constant 4.471500e-02 : f32
    %9 = vector.broadcast %cst_5 : f32 to vector<16x256xf32>
    %10 = arith.mulf %9, %8 : vector<16x256xf32>
    %11 = arith.addf %6, %10 : vector<16x256xf32>
    %cst_6 = arith.constant 0.797884583 : f32
    %12 = vector.broadcast %cst_6 : f32 to vector<16x256xf32>
    %13 = arith.mulf %12, %11 : vector<16x256xf32>
    %14 = math.tanh %13 : vector<16x256xf32>
    %cst_7 = arith.constant 1.000000e+00 : f32
    %15 = vector.broadcast %cst_7 : f32 to vector<16x256xf32>
    %16 = arith.addf %15, %14 : vector<16x256xf32>
    %cst_8 = arith.constant 5.000000e-01 : f32
    %17 = vector.broadcast %cst_8 : f32 to vector<16x256xf32>
    %18 = arith.mulf %17, %16 : vector<16x256xf32>
    %19 = arith.mulf %6, %18 : vector<16x256xf32>
    %20 = arith.truncf %19 : vector<16x256xf32> to vector<16x256xbf16>
    %c0_9 = arith.constant 0 : index
    %c0_10 = arith.constant 0 : index
    %21 = vector.load %arg4[%c0_9, %c0_10] : memref<256x128xbf16, #tpu.memory_space<vmem>>, vector<256x128xbf16>
    %cst_11 = arith.constant dense<0.000000e+00> : vector<16x128xf32>
    %22 = tpu.matmul %20, %21, %cst_11 {dimension_numbers = #tpu.dot_dimension_numbers<[1], [0], [0], [1], [0, 0, 1, 1], [], []>} : vector<16x256xbf16>, vector<256x128xbf16>, vector<16x128xf32> -> vector<16x128xf32>
    %c0_12 = arith.constant 0 : index
    %c0_13 = arith.constant 0 : index
    %23 = vector.load %arg5[%c0_12, %c0_13] : memref<1x128xf32, #tpu.memory_space<vmem>>, vector<1x128xf32>
    %24 = vector.broadcast %23 : vector<1x128xf32> to vector<16x128xf32>
    %25 = arith.addf %22, %24 : vector<16x128xf32>
    %c0_14 = arith.constant 0 : index
    %c0_15 = arith.constant 0 : index
    %26 = vector.load %arg6[%c0_14, %c0_15] : memref<16x128xf32, #tpu.memory_space<vmem>>, vector<16x128xf32>
    tpu.vector_store %arg6[%c0_14, %c0_15], %25 {strides = array<i32>} : memref<16x128xf32, #tpu.memory_space<vmem>>, vector<16x128xf32>,
    return
  }
  func.func @transform_0(%arg0: i32) -> (i32, i32) {
    %c0_i32 = arith.constant 0 : i32
    %c0_i32_0 = arith.constant 0 : i32
    return %arg0, %c0_i32 : i32, i32
  }
  func.func @transform_1(%arg0: i32) -> (i32, i32) {
    %c0_i32 = arith.constant 0 : i32
    %c0_i32_0 = arith.constant 0 : i32
    %c0_i32_1 = arith.constant 0 : i32
    return %c0_i32, %c0_i32_0 : i32, i32
  }
  func.func @transform_2(%arg0: i32) -> (i32, i32) {
    %c0_i32 = arith.constant 0 : i32
    %c0_i32_0 = arith.constant 0 : i32
    %c0_i32_1 = arith.constant 0 : i32
    return %c0_i32, %c0_i32_0 : i32, i32
  }
  func.func @transform_3(%arg0: i32) -> (i32, i32) {
    %c0_i32 = arith.constant 0 : i32
    %c0_i32_0 = arith.constant 0 : i32
    %c0_i32_1 = arith.constant 0 : i32
    return %c0_i32, %c0_i32_0 : i32, i32
  }
  func.func @transform_4(%arg0: i32) -> (i32, i32) {
    %c0_i32 = arith.constant 0 : i32
    %c0_i32_0 = arith.constant 0 : i32
    %c0_i32_1 = arith.constant 0 : i32
    return %c0_i32, %c0_i32_0 : i32, i32
  }
  func.func @transform_5(%arg0: i32) -> (i32, i32) {
    %c0_i32 = arith.constant 0 : i32
    %c0_i32_0 = arith.constant 0 : i32
    return %arg0, %c0_i32 : i32, i32
  }
}

</mosaic_0001>

<bundles_post_ra>
// kernel: position_wise_feed_forward.1
= control target key start
LH: loop header
LB: loop body
LE: loop exit
PB: predicated region body
PF: predicated region fallthrough
CT: control target
= control target key end

     0   :  { %v539_v2 = vmov 0   ;;  %s693_s0 = inlined_call_operand.vmem [shape: f32[16,128], index: 0, kind: input, shape index: {}]   ;;  %s694_s1 = inlined_call_operand.vmem [shape: bf16[128,256], index: 1, kind: input, shape index: {}]   ;;  %s695_s2 = inlined_call_operand.vmem [shape: f32[1,256], index: 2, kind: input, shape index: {}]   ;;  %s696_s3 = inlined_call_operand.vmem [shape: bf16[256,128], index: 3, kind: input, shape index: {}]   ;;  %s697_s4 = inlined_call_operand.vmem [shape: f32[1,128], index: 4, kind: input, shape index: {}]   ;;  %s698_s5 = inlined_call_operand.hbm [shape: f32[16,128], index: 5, kind: output, shape index: {}]  }
   0x1   :  { %v467_v0 = vld [vmem:[%s694_s1 + $0x4] ss:$8 sps:$4 sm:$0xff]   ;;  %v469_v1 = vld [vmem:[%s694_s1] ss:$8 sps:$4 sm:$0xff]   ;;  %165 = vmatprep.mubr.bf16.mxu0 %v539_v2  ;;  %v470_v3 = vld [vmem:[%s694_s1 + $0x14] ss:$8 sps:$4 sm:$0xff]  }
   0x2   :  { %133 = vmatprep.subr.bf16.mxu0 %v467_v0  ;;  %v472_v4 = vld [vmem:[%s694_s1 + $0x10] ss:$8 sps:$4 sm:$0xff]   ;;  %v473_v5 = vld [vmem:[%s694_s1 + $0x24] ss:$8 sps:$4 sm:$0xff]   ;;  %v475_v6 = vld [vmem:[%s694_s1 + $0x20] ss:$8 sps:$4 sm:$0xff]  }
   0x3   :  { %134 = vmatpush1.bf16.msra.mxu0 %v469_v1  ;;  %v476_v7 = vld [vmem:[%s694_s1 + $0x34] ss:$8 sps:$4 sm:$0xff]   ;;  %v478_v8 = vld [vmem:[%s694_s1 + $0x30] ss:$8 sps:$4 sm:$0xff]   ;;  %v479_v9 = vld [vmem:[%s694_s1 + $0x44] ss:$8 sps:$4 sm:$0xff]  }
   0x4   :  { %135 = vmatprep.subr.bf16.mxu0 %v470_v3  ;;  %v481_v10 = vld [vmem:[%s694_s1 + $0x40] ss:$8 sps:$4 sm:$0xff]   ;;  %v482_v11 = vld [vmem:[%s694_s1 + $0x54] ss:$8 sps:$4 sm:$0xff]   ;;  %v484_v12 = vld [vmem:[%s694_s1 + $0x50] ss:$8 sps:$4 sm:$0xff]  }
   0x5   :  { %v485_v13 = vld [vmem:[%s694_s1 + $0x64] ss:$8 sps:$4 sm:$0xff]  }
   0x7   :  { %136 = vmatpush1.bf16.msra.mxu0 %v472_v4 }
   0x8   :  { %137 = vmatprep.subr.bf16.mxu0 %v473_v5 }
   0xb   :  { %138 = vmatpush1.bf16.msra.mxu0 %v475_v6 }
   0xc   :  { %139 = vmatprep.subr.bf16.mxu0 %v476_v7 }
   0xf   :  { %140 = vmatpush1.bf16.msra.mxu0 %v478_v8 }
  0x10   :  { %141 = vmatprep.subr.bf16.mxu0 %v479_v9 }
  0x13   :  { %142 = vmatpush1.bf16.msra.mxu0 %v481_v10 }
  0x14   :  { %143 = vmatprep.subr.bf16.mxu0 %v482_v11 }
  0x15   :  { %10 = vsyncpa [#allocation3], 0  ;;  %v487_v14 = vld [vmem:[%s694_s1 + $0x60] ss:$8 sps:$4 sm:$0xff]   ;;  %v488_v15 = vld [vmem:[%s694_s1 + $0x74] ss:$8 sps:$4 sm:$0xff]   ;;  %v43_v36 = vlaneseq }
  0x16   :  { %v490_v16 = vld [vmem:[%s694_s1 + $0x70] ss:$8 sps:$4 sm:$0xff]   ;;  %v22_v17 = vld [vmem:[%s693_s0] sm:$0xff]  ;;  %v23_v18 = vld [vmem:[%s693_s0 + $0x8] sm:$0xff]  ;;  %s540_s0 = smov [#allocation2]  }
  0x17   :  { %144 = vmatpush1.bf16.msra.mxu0 %v484_v12  ;;  %v24_v19 = vpack.c.bf16 %v23_v18, %v22_v17  ;;  %v491_v20 = vld [vmem:[%s696_s3 + $0x40] sm:$0xff]   ;;  %v493_v22 = vld [vmem:[%s696_s3 + $0x48] sm:$0xff]   ;;  %v495_v24 = vld [vmem:[%s696_s3 + $0x50] sm:$0xff]   ;;  %v44_v37 = vshrl.u32 %v43_v36, 7  ;;  %s397_s10 = sshll.u32 %s540_s0, 4  ;;  %s398_s10 = int_to_ptr.vmem [resolvable:$true] %s397_s10 }
  0x18   :  { %145 = vmatprep.subr.bf16.mxu0 %v485_v13  ;;  %v492_v21 = vld [vmem:[%s696_s3] sm:$0xff]   ;;  %441 = vmatprep.subr.bf16.mxu1 %v491_v20  ;;  %v494_v23 = vld [vmem:[%s696_s3 + $0x8] sm:$0xff]   ;;  %v496_v25 = vld [vmem:[%s696_s3 + $0x10] sm:$0xff]   ;;  %s515_s11 = scalar_lea.vmem %s398_s10, 256  ;;  %p520_p1 = scmp.lt.s32.totalorder %s398_s10, %s398_s10 }
  0x19   :  { %442 = vmatpush3.bf16.msra.mxu1 %v492_v21  ;;  %v497_v26 = vld [vmem:[%s696_s3 + $0x58] sm:$0xff]   ;;  %v499_v28 = vld [vmem:[%s696_s3 + $0x60] sm:$0xff]   ;;  %v501_v30 = vld [vmem:[%s696_s3 + $0x68] sm:$0xff]   ;;  %v45_v38 = vsub.s32 0, %v44_v37  ;;  %v49_v40 = vsub.s32 1, %v44_v37  ;;  %p516_p0 = scmp.ne.s32.totalorder %s398_s10, %s515_s11  ;;  %p521_p2 = scmp.lt.s32.totalorder %s515_s11, %s515_s11 }
  0x1a   :  { %443 = vmatprep.subr.bf16.mxu1 %v493_v22  ;;  %v498_v27 = vld [vmem:[%s696_s3 + $0x18] sm:$0xff]   ;;  %v500_v29 = vld [vmem:[%s696_s3 + $0x20] sm:$0xff]   ;;  %v502_v31 = vld [vmem:[%s696_s3 + $0x28] sm:$0xff]  }
  0x1b   :  { %146 = vmatpush1.bf16.msra.mxu0 %v487_v14  ;;  %v503_v32 = vld [vmem:[%s696_s3 + $0x70] sm:$0xff]   ;;  %v505_v34 = vld [vmem:[%s696_s3 + $0x78] sm:$0xff]   ;;  %v41_v39 = vld [vmem:[%s695_s2] sm:$0x3]  ;;  %p522_p3 = por %p521_p2, %p520_p1 }
  0x1c   :  { %147 = vmatprep.subr.bf16.mxu0 %v488_v15  ;;  %v504_v33 = vld [vmem:[%s696_s3 + $0x30] sm:$0xff]   ;;  %v506_v35 = vld [vmem:[%s696_s3 + $0x38] sm:$0xff]   ;;  %v46_v41 = vrot.slane %v41_v39, %v45_v38  ;;  %v50_v42 = vrot.slane %v41_v39, %v49_v40 }
  0x1d   :  { %444 = vmatpush3.bf16.msra.mxu1 %v494_v23  ;;  %p523_p4 = pnand %p522_p3, %p516_p0 }
  0x1e   :  { %445 = vmatprep.subr.bf16.mxu1 %v495_v24 }
  0x1f   :  { %148 = vmatpush1.bf16.msra.mxu0 %v490_v16 }
  0x21   :  { %446 = vmatpush3.bf16.msra.mxu1 %v496_v25 }
  0x22   :  { %166 = vmatmul.mubr.bf16.vlgmr.msra.gmra.mrb[0].mxu0 %v24_v19  ;;  %447 = vmatprep.subr.bf16.mxu1 %v497_v26  ;;  %v424_v26 = vld [vmem:[%s697_s4] ss:$0 sm:$0xff] }
  0x25   :  { %448 = vmatpush3.bf16.msra.mxu1 %v498_v27 }
  0x26   :  { %449 = vmatprep.subr.bf16.mxu1 %v499_v28 }
  0x29   :  { %450 = vmatpush3.bf16.msra.mxu1 %v500_v29 }
  0x2a   :  { %451 = vmatprep.subr.bf16.mxu1 %v501_v30 }
  0x2d   :  { %452 = vmatpush3.bf16.msra.mxu1 %v502_v31 }
  0x2e   :  { %453 = vmatprep.subr.bf16.mxu1 %v503_v32 }
  0x31   :  { %454 = vmatpush3.bf16.msra.mxu1 %v504_v33 }
  0x32   :  { %455 = vmatprep.subr.bf16.mxu1 %v505_v34 }
  0x35   :  { %456 = vmatpush3.bf16.msra.mxu1 %v506_v35 }
  0xf5   :  { %v167_v43 = vpop.f32.mrb[0].mxu0 }
  0xf6   :  { %v168_v44 = vadd.f32 %v167_v43, %v46_v41  ;;  %v169_v45 = vpop.f32.mrb[1].mxu0 }
  0xf7   :  { %v170_v46 = vadd.f32 %v169_v45, %v50_v42  ;;  %v171_v47 = vpop.f32.mrb[2].mxu0 }
  0xf8   :  { %v176_v48 = vmul.f32 %v168_v44, %v168_v44  ;;  %v172_v49 = vadd.f32 %v171_v47, %v46_v41  ;;  %v173_v50 = vpop.f32.mrb[3].mxu0 }
  0xf9   :  { %v177_v51 = vmul.f32 %v170_v46, %v170_v46  ;;  %v174_v52 = vadd.f32 %v173_v50, %v50_v42 }
  0xfa   :  { %v180_v53 = vmul.f32 %v176_v48, %v168_v44  ;;  %v178_v54 = vmul.f32 %v172_v49, %v172_v49 }
  0xfb   :  { %v181_v55 = vmul.f32 %v177_v51, %v170_v46  ;;  %v179_v56 = vmul.f32 %v174_v52, %v174_v52 }
  0xfc   :  { %v184_v57 = vmul.f32 0.044715, %v180_v53  ;;  %v182_v58 = vmul.f32 %v178_v54, %v172_v49 }
  0xfd   :  { %v185_v59 = vmul.f32 0.044715, %v181_v55  ;;  %v183_v60 = vmul.f32 %v179_v56, %v174_v52 }
  0xfe   :  { %v188_v61 = vadd.f32 %v184_v57, %v168_v44  ;;  %v186_v62 = vmul.f32 0.044715, %v182_v58 }
  0xff   :  { %v187_v63 = vmul.f32 0.044715, %v183_v60  ;;  %v189_v0 = vadd.f32 %v185_v59, %v170_v46 }
 0x100   :  { %v192_v1 = vmul.f32 0.7978846, %v188_v61  ;;  %v190_v2 = vadd.f32 %v186_v62, %v172_v49 }
 0x101   :  { %v191_v3 = vadd.f32 %v187_v63, %v174_v52  ;;  %v193_v4 = vmul.f32 0.7978846, %v189_v0 }
 0x102   :  { %507 = vtanh.f32 %v192_v1  ;;  %v194_v5 = vmul.f32 0.7978846, %v190_v2 }
 0x103   :  { %v195_v6 = vmul.f32 0.7978846, %v191_v3  ;;  %509 = vtanh.f32 %v193_v4 }
 0x104   :  { %511 = vtanh.f32 %v194_v5 }
 0x105   :  { %513 = vtanh.f32 %v195_v6 }
 0x10c   :  { %v508_v7 = vpop.eup %507 }
 0x10d   :  { %v510_v8 = vpop.eup %509  ;;  %v200_v9 = vadd.f32 1.0, %v508_v7 }
 0x10e   :  { %v512_v10 = vpop.eup %511  ;;  %v201_v11 = vadd.f32 1.0, %v510_v8 }
 0x10f   :  { %v514_v12 = vpop.eup %513  ;;  %v202_v13 = vadd.f32 1.0, %v512_v10  ;;  %v204_v14 = vmul.f32 0.5, %v200_v9 }
 0x110   :  { %v203_v15 = vadd.f32 1.0, %v514_v12  ;;  %v205_v16 = vmul.f32 0.5, %v201_v11 }
 0x111   :  { %v206_v17 = vmul.f32 0.5, %v202_v13  ;;  %v208_v19 = vmul.f32 %v204_v14, %v168_v44 }
 0x112   :  { %v207_v18 = vmul.f32 0.5, %v203_v15  ;;  %v209_v21 = vmul.f32 %v205_v16, %v170_v46 }
 0x113   :  { %v210_v20 = vmul.f32 %v206_v17, %v172_v49 }
 0x114   :  { %v211_v22 = vmul.f32 %v207_v18, %v174_v52 }
 0x115   :  { %v212_v23 = vpack.c.bf16 %v210_v20, %v208_v19 }
 0x116   :  { %v213_v24 = vpack.c.bf16 %v211_v22, %v209_v21 }
 0x118   :  { %381 = vmatprep.mubr.bf16.mxu1 %v213_v24 }
 0x119   :  { %382 = vmatmul.mubr.bf16.vlgmr.msra.gmra.mrb[0].mxu1 %v212_v23 }
 0x1ec   :  { %v457_v25 = vpop.f32.mrb[0].mxu1 }
 0x1ed   :  { %v458_v27 = vpop.f32.mrb[1].mxu1 }
 0x1ee   :  { %v459_v28 = vadd.f32 %v458_v27, %v457_v25  ;;  %v460_v29 = vpop.f32.mrb[2].mxu1 }
 0x1ef   :  { %v461_v30 = vpop.f32.mrb[3].mxu1 }
 0x1f0   :  { %v384_v31 = vadd.f32 %v459_v28, %v424_v26  ;;  %v462_v32 = vadd.f32 %v461_v30, %v460_v29 }
 0x1f2   :  { %390 = vst [vmem:[#allocation2] sm:$0xff] %v384_v31  ;;  %v387_v33 = vadd.f32 %v462_v32, %v424_v26 }
 0x1f4   :  { %391 = vst [vmem:[#allocation2 + $0x8] sm:$0xff] %v387_v33 }
 0x1f5   :  { %526 = shalt.err (!%p523_p4)
}
 0x1f6   :  { %s527_s13 = scalar_lea.hbm %s698_s5, 256 }
 0x1f7   :  { %p528_p5 = scmp.ne.s32.totalorder %s698_s5, %s527_s13  ;;  %p531_p6 = scmp.lt.u32.totalorder %s527_s13, %s698_s5 }
 0x1f9   :  { %p533_p7 = pnand %p531_p6, %p528_p5 }
 0x1fb   :  { %536 = shalt.err (!%p533_p7)
}
 0x1fc   :  { %s541_s18 = smov 128   ;;  %s542_s19 = smov 8  }
 0x1fd   :  { %403 = dma.vmem_to_hbm [thread:$0]  %s398_s10, 256, %s698_s5, [#allocation3], %s541_s18, %s541_s18, %s542_s19  }
 0x1fe   :  { %537 = dma.done.wait [#allocation3], 256  }
 0x1ff   :  { %538 = vsyncadd [#allocation3], 4294967040 }
 0x200   :  { %407 = vsyncpa [#allocation3], 1 }

</bundles_post_ra>
